<compile_context>
chip_gen: v5e
topology: v5e:2x2
jax: 0.10.0
libtpu: 0.0.40
codegen_flags: <defaults>
</compile_context>

<pallas_src>
import jax
import jax.numpy as jnp
from jax.experimental import pallas as pl
from jax.experimental.pallas import tpu as pltpu


def _round_up(x, m):
    return (x + m - 1) // m * m


def _make_kernel(weights_resident):
    def kernel(x_ref, w_ref, b_ref, o_ref):
        """One (row_tile, layer) grid step.

        x_ref: (tm, Sp)              input rows (read only at layer 0)
        w_ref: (L, Sp, 3Sp) resident | (1, Sp, 3Sp) streamed   fused weights (bf16)
        b_ref: (L, 1, 3Sp)           fused biases (f32), VMEM-resident
        o_ref: (tm, Sp)              output rows; doubles as the f32 carry —
                                     its block index is constant over the layer
                                     axis, so it stays resident in VMEM.
        """
        layer = pl.program_id(1)

        @pl.when(layer == 0)
        def _():
            o_ref[...] = x_ref[...]

        x = o_ref[...]                                     # f32 carry
        w = w_ref[layer] if weights_resident else w_ref[0]  # (Sp, 3Sp) bf16
        b = b_ref[layer]                                   # (1, 3Sp) f32

        # bf16 x bf16 -> f32 accumulation (full MXU rate); only the (tm, Sp)
        # carry is cast, the weights are fed in their storage dtype.
        z = jnp.dot(x.astype(w.dtype), w, preferred_element_type=jnp.float32) + b

        sp = o_ref.shape[-1]                               # multiple of 128
        zg = z[:, :sp]
        zn = z[:, sp:2 * sp]
        zl = z[:, 2 * sp:]

        gate = jax.nn.sigmoid(zg)                          # EUP
        nonlinear = jnp.maximum(zn, 0.0)                   # relu
        new_x = zl + gate * (nonlinear - zl)               # == g*nl + (1-g)*lin
        o_ref[...] = new_x.astype(o_ref.dtype)

    return kernel


def pack_highway_params(wg, bg, wn, bn, wl, bl, *, weight_dtype=jnp.bfloat16):
    """Offline packing of PyTorch-layout params into fused, lane-padded tensors.

    wg/wn/wl: [L, S, S] in nn.Linear (out, in) convention; b*: [L, S].
    Returns:
      w_cat [L, Sp, 3*Sp]  pre-transposed so the kernel computes x @ W (weight_dtype)
      b_cat [L, 1, 3*Sp]   fused biases (f32)
      Sp                   lane-padded feature dim (multiple of 128)
    """
    L, S, _ = wg.shape
    Sp = _round_up(S, 128)

    def prep_w(w):
        wt = jnp.swapaxes(w, -1, -2)                       # (L, in, out) for x @ W
        return jnp.pad(wt, ((0, 0), (0, Sp - S), (0, Sp - S)))

    def prep_b(b):
        return jnp.pad(b, ((0, 0), (0, Sp - S)))

    w_cat = jnp.concatenate([prep_w(wg), prep_w(wn), prep_w(wl)], axis=-1)
    b_cat = jnp.concatenate([prep_b(bg), prep_b(bn), prep_b(bl)], axis=-1)
    return w_cat.astype(weight_dtype), b_cat.astype(jnp.float32)[:, None, :], Sp


def highway_pallas(x, w_cat, b_cat, *, block_rows=None, weight_buffers=None):
    """x: [N, S] f32.  w_cat: [L, Sp, 3*Sp] (packed).  b_cat: [L, 1, 3*Sp] f32."""
    N, S = x.shape
    L, Sp, Sp3 = w_cat.shape
    assert Sp3 == 3 * Sp and Sp >= S and Sp % 128 == 0
    assert b_cat.shape == (L, 1, 3 * Sp)

    wbytes = jnp.dtype(w_cat.dtype).itemsize

    # --- Per-generation VMEM budget (v5e/v6e: 128 MiB, v7x: 64 MiB per core). ---
    try:
        phys_vmem = int(pltpu.get_tpu_info().vmem_capacity_bytes)
    except Exception:
        phys_vmem = 64 << 20                    # conservative (v7x per-core)
    budget = int(phys_vmem * 0.7)               # headroom for compiler scratch

    # --- Weight residency: keep the whole fused stack in VMEM when it fits. ---
    w_resident_bytes = L * Sp * 3 * Sp * wbytes
    weights_resident = (weight_buffers is None) and (w_resident_bytes <= budget // 2)
    w_foot = (w_resident_bytes if weights_resident
              else (weight_buffers or 2) * Sp * 3 * Sp * wbytes)
    b_foot = 2 * L * 3 * Sp * 4

    def act_bytes(tm):
        # x in (2-buffered) + out/carry (2-buffered) + z intermediate + bf16 carry copy
        return 2 * tm * Sp * 4 + 2 * tm * Sp * 4 + tm * 3 * Sp * 4 + tm * Sp * wbytes

    # --- Row tile: as big as the budget allows (multiple of 8 sublanes). ---
    if block_rows is not None:
        tm = _round_up(block_rows, 8)
    else:
        tm = min(_round_up(N, 8), 1024)
        while tm > 8 and w_foot + b_foot + act_bytes(tm) > budget:
            tm = _round_up(tm // 2, 8)
        # Megacore occupancy (v7x): the row axis is the only parallel axis, so
        # make sure there are at least two row tiles when N allows it.
        if _round_up(N, tm) // tm < 2 and tm > 8:
            tm = max(8, _round_up(tm // 2, 8))

    Np = _round_up(N, tm)
    n_tiles = Np // tm

    xp = x
    if (Np, Sp) != (N, S):
        # Zero padding is self-consistent: padded lanes stay exactly 0 through
        # every layer; padded rows only ever see the bias and are sliced off.
        xp = jnp.pad(x, ((0, Np - N), (0, Sp - S)))

    row_spec = pl.BlockSpec((tm, Sp), lambda i, l: (i, 0))

    vmem_est = w_foot + b_foot + act_bytes(tm)
    vmem_limit = min(int(phys_vmem * 0.9), max(32 << 20, int(vmem_est * 1.25)))

    w_hbm_bytes = (w_resident_bytes if weights_resident
                   else n_tiles * L * Sp * 3 * Sp * wbytes)
    cost = pl.CostEstimate(
        flops=2 * Np * Sp * 3 * Sp * L,
        transcendentals=Np * Sp * L,                            # sigmoid
        bytes_accessed=w_hbm_bytes + L * 3 * Sp * 4 + 2 * Np * Sp * 4,
    )

    def build(pipelined):
        if weights_resident:
            wkw = {"pipeline_mode": pl.Buffered(1)} if pipelined else {}
            w_spec = pl.BlockSpec((L, Sp, 3 * Sp), lambda i, l: (0, 0, 0), **wkw)
        else:
            wkw = ({"pipeline_mode": pl.Buffered(weight_buffers)}
                   if (pipelined and weight_buffers) else {})
            w_spec = pl.BlockSpec((1, Sp, 3 * Sp), lambda i, l: (l, 0, 0), **wkw)
        b_spec = pl.BlockSpec((L, 1, 3 * Sp), lambda i, l: (0, 0, 0))

        return pl.pallas_call(
            _make_kernel(weights_resident),
            out_shape=jax.ShapeDtypeStruct((Np, Sp), x.dtype),
            grid_spec=pltpu.PrefetchScalarGridSpec(
                num_scalar_prefetch=0,
                grid=(n_tiles, L),                # layer axis innermost: carry resident
                in_specs=[row_spec, w_spec, b_spec],
                out_specs=row_spec,
            ),
            compiler_params=pltpu.CompilerParams(
                dimension_semantics=("parallel", "arbitrary"),
                vmem_limit_bytes=vmem_limit,
            ),
            cost_estimate=cost,
        )

    try:
        out = build(pipelined=True)(xp, w_cat, b_cat)
    except Exception:
        # Fallback for JAX versions that reject pipeline_mode=pl.Buffered(...)
        # on pallas_call BlockSpecs; identical semantics, default buffering.
        out = build(pipelined=False)(xp, w_cat, b_cat)

    return out[:N, :S]


def highway_ref(x, wg, bg, wn, bn, wl, bl, *, weight_dtype=jnp.bfloat16):
    """Pure-JAX reference mirroring the PyTorch forward, with the same mixed
    precision the kernel uses (bf16-rounded matmul operands, f32 accumulation,
    f32 everywhere else)."""
    L = wg.shape[0]
    for l in range(L):
        xq = x.astype(weight_dtype).astype(jnp.float32)
        wgl = wg[l].astype(weight_dtype).astype(jnp.float32)
        wnl = wn[l].astype(weight_dtype).astype(jnp.float32)
        wll = wl[l].astype(weight_dtype).astype(jnp.float32)
        gate = jax.nn.sigmoid(xq @ wgl.T + bg[l])
        nonlinear = jnp.maximum(xq @ wnl.T + bn[l], 0.0)
        linear = xq @ wll.T + bl[l]
        x = gate * nonlinear + (1.0 - gate) * linear
    return x


def init_params(key, size, numlayers):
    """Deterministic nn.Linear-style init: U(-1/sqrt(size), 1/sqrt(size))."""
    bound = 1.0 / jnp.sqrt(jnp.float32(size))
    keys = jax.random.split(key, 6)

    def u(k, shape):
        return jax.random.uniform(k, shape, jnp.float32, -bound, bound)

    wg = u(keys[0], (numlayers, size, size))   # (out, in) convention
    wn = u(keys[1], (numlayers, size, size))
    wl = u(keys[2], (numlayers, size, size))
    bg = u(keys[3], (numlayers, size))
    bn = u(keys[4], (numlayers, size))
    bl = u(keys[5], (numlayers, size))
    return wg, bg, wn, bn, wl, bl


if __name__ == "__main__":
    N = 16          # rows (e.g. batch*seq)
    SIZE = 32       # highway hidden size
    NUMLAYERS = 3

    key = jax.random.PRNGKey(0)
    kx, kp = jax.random.split(key)
    x = jax.random.normal(kx, (N, SIZE), jnp.float32)
    wg, bg, wn, bn, wl, bl = init_params(kp, SIZE, NUMLAYERS)

    w_cat, b_cat, _ = pack_highway_params(wg, bg, wn, bn, wl, bl)

    out = highway_pallas(x, w_cat, b_cat)
    out = jax.block_until_ready(out)

    ref = highway_ref(x, wg, bg, wn, bn, wl, bl)
    assert out.shape == (N, SIZE)
    assert jnp.allclose(out, ref, atol=2e-4, rtol=2e-4), "mismatch vs reference"

    print("KERNEL_OK")
</pallas_src>

<mosaic_0001>
module attributes {stable_mosaic.version = 11 : i64} {
  func.func @kernel(%arg0: i32, %arg1: i32, %arg2: memref<8x128xf32, #tpu.memory_space<vmem>>, %arg3: memref<3x128x384xbf16, #tpu.memory_space<vmem>>, %arg4: memref<3x1x384xf32, #tpu.memory_space<vmem>>, %arg5: memref<8x128xf32, #tpu.memory_space<vmem>>) attributes {dimension_semantics = [#tpu.dimension_semantics<parallel>, #tpu.dimension_semantics<arbitrary>], iteration_bounds = array<i64: 2, 3>, scalar_prefetch = 0 : i64, scratch_operands = 0 : i64, tpu.core_type = #tpu.core_type<tc>, window_params = [{transform_indices = @transform_0, window_bounds = array<i64: 8, 128>}, {pipeline_mode = #tpu.pipeline_mode<synchronous>, transform_indices = @transform_1, window_bounds = array<i64: 3, 128, 384>}, {pipeline_mode = #tpu.pipeline_mode<synchronous>, transform_indices = @transform_2, window_bounds = array<i64: 3, 1, 384>}, {transform_indices = @transform_3, window_bounds = array<i64: 8, 128>}]} {
    %c0_i32 = arith.constant 0 : i32
    %0 = arith.cmpi eq, %arg1, %c0_i32 : i32
    %1 = arith.extui %0 : i1 to i32
    %c0_i32_0 = arith.constant 0 : i32
    %2 = arith.cmpi ne, %1, %c0_i32_0 : i32
    scf.if %2 {
      %c0_10 = arith.constant 0 : index
      %c0_11 = arith.constant 0 : index
      %28 = vector.load %arg2[%c0_10, %c0_11] : memref<8x128xf32, #tpu.memory_space<vmem>>, vector<8x128xf32>
      %c0_12 = arith.constant 0 : index
      %c0_13 = arith.constant 0 : index
      %29 = vector.load %arg5[%c0_12, %c0_13] : memref<8x128xf32, #tpu.memory_space<vmem>>, vector<8x128xf32>
      tpu.vector_store %arg5[%c0_12, %c0_13], %28 {strides = array<i32>} : memref<8x128xf32, #tpu.memory_space<vmem>>, vector<8x128xf32>,
    } else {
    }
    %c0 = arith.constant 0 : index
    %c0_1 = arith.constant 0 : index
    %3 = vector.load %arg5[%c0, %c0_1] : memref<8x128xf32, #tpu.memory_space<vmem>>, vector<8x128xf32>
    %4 = arith.index_cast %arg1 : i32 to index
    %c0_2 = arith.constant 0 : index
    %c0_3 = arith.constant 0 : index
    %5 = vector.load %arg3[%4, %c0_2, %c0_3] : memref<3x128x384xbf16, #tpu.memory_space<vmem>>, vector<1x128x384xbf16>
    %6 = vector.shape_cast %5 : vector<1x128x384xbf16> to vector<128x384xbf16>
    %7 = arith.index_cast %arg1 : i32 to index
    %c0_4 = arith.constant 0 : index
    %c0_5 = arith.constant 0 : index
    %8 = vector.load %arg4[%7, %c0_4, %c0_5] : memref<3x1x384xf32, #tpu.memory_space<vmem>>, vector<1x1x384xf32>
    %9 = vector.shape_cast %8 : vector<1x1x384xf32> to vector<1x384xf32>
    %10 = arith.truncf %3 : vector<8x128xf32> to vector<8x128xbf16>
    %cst = arith.constant dense<0.000000e+00> : vector<8x384xf32>
    %11 = tpu.matmul %10, %6, %cst {dimension_numbers = #tpu.dot_dimension_numbers<[1], [0], [0], [1], [0, 0, 1, 1], [], []>} : vector<8x128xbf16>, vector<128x384xbf16>, vector<8x384xf32> -> vector<8x384xf32>
    %12 = vector.broadcast %9 : vector<1x384xf32> to vector<8x384xf32>
    %13 = arith.addf %11, %12 : vector<8x384xf32>
    %14 = vector.extract_strided_slice %13 {offsets = [0, 0], sizes = [8, 128], strides = [1, 1]} : vector<8x384xf32> to vector<8x128xf32>
    %15 = vector.extract_strided_slice %13 {offsets = [0, 128], sizes = [8, 128], strides = [1, 1]} : vector<8x384xf32> to vector<8x128xf32>
    %16 = vector.extract_strided_slice %13 {offsets = [0, 256], sizes = [8, 128], strides = [1, 1]} : vector<8x384xf32> to vector<8x128xf32>
    %17 = arith.negf %14 : vector<8x128xf32>
    %18 = math.exp %17 : vector<8x128xf32>
    %cst_6 = arith.constant 1.000000e+00 : f32
    %19 = vector.broadcast %cst_6 : f32 to vector<8x128xf32>
    %20 = arith.addf %19, %18 : vector<8x128xf32>
    %21 = arith.divf %19, %20 : vector<8x128xf32>
    %cst_7 = arith.constant 0.000000e+00 : f32
    %22 = vector.broadcast %cst_7 : f32 to vector<8x128xf32>
    %23 = arith.maximumf %15, %22 : vector<8x128xf32>
    %24 = arith.subf %23, %16 : vector<8x128xf32>
    %25 = arith.mulf %21, %24 : vector<8x128xf32>
    %26 = arith.addf %16, %25 : vector<8x128xf32>
    %c0_8 = arith.constant 0 : index
    %c0_9 = arith.constant 0 : index
    %27 = vector.load %arg5[%c0_8, %c0_9] : memref<8x128xf32, #tpu.memory_space<vmem>>, vector<8x128xf32>
    tpu.vector_store %arg5[%c0_8, %c0_9], %26 {strides = array<i32>} : memref<8x128xf32, #tpu.memory_space<vmem>>, vector<8x128xf32>,
    return
  }
  func.func @transform_0(%arg0: i32, %arg1: i32) -> (i32, i32) {
    %c0_i32 = arith.constant 0 : i32
    %c0_i32_0 = arith.constant 0 : i32
    return %arg0, %c0_i32 : i32, i32
  }
  func.func @transform_1(%arg0: i32, %arg1: i32) -> (i32, i32, i32) {
    %c0_i32 = arith.constant 0 : i32
    %c0_i32_0 = arith.constant 0 : i32
    %c0_i32_1 = arith.constant 0 : i32
    %c0_i32_2 = arith.constant 0 : i32
    return %c0_i32, %c0_i32_0, %c0_i32_1 : i32, i32, i32
  }
  func.func @transform_2(%arg0: i32, %arg1: i32) -> (i32, i32, i32) {
    %c0_i32 = arith.constant 0 : i32
    %c0_i32_0 = arith.constant 0 : i32
    %c0_i32_1 = arith.constant 0 : i32
    %c0_i32_2 = arith.constant 0 : i32
    return %c0_i32, %c0_i32_0, %c0_i32_1 : i32, i32, i32
  }
  func.func @transform_3(%arg0: i32, %arg1: i32) -> (i32, i32) {
    %c0_i32 = arith.constant 0 : i32
    %c0_i32_0 = arith.constant 0 : i32
    return %arg0, %c0_i32 : i32, i32
  }
}

module attributes {stable_mosaic.version = 11 : i64} {
  func.func @kernel(%arg0: i32, %arg1: i32, %arg2: memref<8x128xf32, #tpu.memory_space<vmem>>, %arg3: memref<3x128x384xbf16, #tpu.memory_space<vmem>>, %arg4: memref<3x1x384xf32, #tpu.memory_space<vmem>>, %arg5: memref<8x128xf32, #tpu.memory_space<vmem>>) attributes {dimension_semantics = [#tpu.dimension_semantics<parallel>, #tpu.dimension_semantics<arbitrary>], iteration_bounds = array<i64: 2, 3>, scalar_prefetch = 0 : i64, scratch_operands = 0 : i64, tpu.core_type = #tpu.core_type<tc>, window_params = [{transform_indices = @transform_0, window_bounds = array<i64: 8, 128>}, {pipeline_mode = #tpu.pipeline_mode<synchronous>, transform_indices = @transform_1, window_bounds = array<i64: 3, 128, 384>}, {pipeline_mode = #tpu.pipeline_mode<synchronous>, transform_indices = @transform_2, window_bounds = array<i64: 3, 1, 384>}, {transform_indices = @transform_3, window_bounds = array<i64: 8, 128>}]} {
    %c0_i32 = arith.constant 0 : i32
    %0 = arith.cmpi eq, %arg1, %c0_i32 : i32
    %1 = arith.extui %0 : i1 to i32
    %c0_i32_0 = arith.constant 0 : i32
    %2 = arith.cmpi ne, %1, %c0_i32_0 : i32
    scf.if %2 {
      %c0_10 = arith.constant 0 : index
      %c0_11 = arith.constant 0 : index
      %28 = vector.load %arg2[%c0_10, %c0_11] : memref<8x128xf32, #tpu.memory_space<vmem>>, vector<8x128xf32>
      %c0_12 = arith.constant 0 : index
      %c0_13 = arith.constant 0 : index
      %29 = vector.load %arg5[%c0_12, %c0_13] : memref<8x128xf32, #tpu.memory_space<vmem>>, vector<8x128xf32>
      tpu.vector_store %arg5[%c0_12, %c0_13], %28 {strides = array<i32>} : memref<8x128xf32, #tpu.memory_space<vmem>>, vector<8x128xf32>,
    } else {
    }
    %c0 = arith.constant 0 : index
    %c0_1 = arith.constant 0 : index
    %3 = vector.load %arg5[%c0, %c0_1] : memref<8x128xf32, #tpu.memory_space<vmem>>, vector<8x128xf32>
    %4 = arith.index_cast %arg1 : i32 to index
    %c0_2 = arith.constant 0 : index
    %c0_3 = arith.constant 0 : index
    %5 = vector.load %arg3[%4, %c0_2, %c0_3] : memref<3x128x384xbf16, #tpu.memory_space<vmem>>, vector<1x128x384xbf16>
    %6 = vector.shape_cast %5 : vector<1x128x384xbf16> to vector<128x384xbf16>
    %7 = arith.index_cast %arg1 : i32 to index
    %c0_4 = arith.constant 0 : index
    %c0_5 = arith.constant 0 : index
    %8 = vector.load %arg4[%7, %c0_4, %c0_5] : memref<3x1x384xf32, #tpu.memory_space<vmem>>, vector<1x1x384xf32>
    %9 = vector.shape_cast %8 : vector<1x1x384xf32> to vector<1x384xf32>
    %10 = arith.truncf %3 : vector<8x128xf32> to vector<8x128xbf16>
    %cst = arith.constant dense<0.000000e+00> : vector<8x384xf32>
    %11 = tpu.matmul %10, %6, %cst {dimension_numbers = #tpu.dot_dimension_numbers<[1], [0], [0], [1], [0, 0, 1, 1], [], []>} : vector<8x128xbf16>, vector<128x384xbf16>, vector<8x384xf32> -> vector<8x384xf32>
    %12 = vector.broadcast %9 : vector<1x384xf32> to vector<8x384xf32>
    %13 = arith.addf %11, %12 : vector<8x384xf32>
    %14 = vector.extract_strided_slice %13 {offsets = [0, 0], sizes = [8, 128], strides = [1, 1]} : vector<8x384xf32> to vector<8x128xf32>
    %15 = vector.extract_strided_slice %13 {offsets = [0, 128], sizes = [8, 128], strides = [1, 1]} : vector<8x384xf32> to vector<8x128xf32>
    %16 = vector.extract_strided_slice %13 {offsets = [0, 256], sizes = [8, 128], strides = [1, 1]} : vector<8x384xf32> to vector<8x128xf32>
    %17 = arith.negf %14 : vector<8x128xf32>
    %18 = math.exp %17 : vector<8x128xf32>
    %cst_6 = arith.constant 1.000000e+00 : f32
    %19 = vector.broadcast %cst_6 : f32 to vector<8x128xf32>
    %20 = arith.addf %19, %18 : vector<8x128xf32>
    %21 = arith.divf %19, %20 : vector<8x128xf32>
    %cst_7 = arith.constant 0.000000e+00 : f32
    %22 = vector.broadcast %cst_7 : f32 to vector<8x128xf32>
    %23 = arith.maximumf %15, %22 : vector<8x128xf32>
    %24 = arith.subf %23, %16 : vector<8x128xf32>
    %25 = arith.mulf %21, %24 : vector<8x128xf32>
    %26 = arith.addf %16, %25 : vector<8x128xf32>
    %c0_8 = arith.constant 0 : index
    %c0_9 = arith.constant 0 : index
    %27 = vector.load %arg5[%c0_8, %c0_9] : memref<8x128xf32, #tpu.memory_space<vmem>>, vector<8x128xf32>
    tpu.vector_store %arg5[%c0_8, %c0_9], %26 {strides = array<i32>} : memref<8x128xf32, #tpu.memory_space<vmem>>, vector<8x128xf32>,
    return
  }
  func.func @transform_0(%arg0: i32, %arg1: i32) -> (i32, i32) {
    %c0_i32 = arith.constant 0 : i32
    %c0_i32_0 = arith.constant 0 : i32
    return %arg0, %c0_i32 : i32, i32
  }
  func.func @transform_1(%arg0: i32, %arg1: i32) -> (i32, i32, i32) {
    %c0_i32 = arith.constant 0 : i32
    %c0_i32_0 = arith.constant 0 : i32
    %c0_i32_1 = arith.constant 0 : i32
    %c0_i32_2 = arith.constant 0 : i32
    return %c0_i32, %c0_i32_0, %c0_i32_1 : i32, i32, i32
  }
  func.func @transform_2(%arg0: i32, %arg1: i32) -> (i32, i32, i32) {
    %c0_i32 = arith.constant 0 : i32
    %c0_i32_0 = arith.constant 0 : i32
    %c0_i32_1 = arith.constant 0 : i32
    %c0_i32_2 = arith.constant 0 : i32
    return %c0_i32, %c0_i32_0, %c0_i32_1 : i32, i32, i32
  }
  func.func @transform_3(%arg0: i32, %arg1: i32) -> (i32, i32) {
    %c0_i32 = arith.constant 0 : i32
    %c0_i32_0 = arith.constant 0 : i32
    return %arg0, %c0_i32 : i32, i32
  }
}

</mosaic_0001>

<bundles_post_ra>
// kernel: tpu_custom_call.1
= control target key start
LH: loop header
LB: loop body
LE: loop exit
PB: predicated region body
PF: predicated region fallthrough
CT: control target
= control target key end

     0   :  { %s1298_s0 = inlined_call_operand.hbm [shape: f32[16,128], index: 0, kind: input, shape index: {}]   ;;  %s1299_s1 = inlined_call_operand.hbm [shape: bf16[3,128,384], index: 1, kind: input, shape index: {}]   ;;  %s1300_s2 = inlined_call_operand.hbm [shape: f32[3,1,384], index: 2, kind: input, shape index: {}]   ;;  %s1301_s3 = inlined_call_operand.hbm [shape: f32[16,128], index: 3, kind: output, shape index: {}]  }
   0x1   :  { %1302 = sst [smem:[#allocation12_spill]] %s1299_s1 }
   0x2   :  { %8 = vsyncpa [#allocation3], 0 }
   0x3   :  { %10 = vsyncpa [#allocation3 + $0x1], 0 }
   0x4   :  { %11 = vsyncpa [#allocation6], 0 }
   0x5   :  { %12 = vsyncpa [#allocation4], 0 }
   0x6   :  { %14 = vsyncpa [#allocation4 + $0x1], 0  ;;  %s1065_s12 = smov 0   ;;  %s1067_s13 = smov 0  }
   0x7   :  { %s1069_s14 = smov 0   ;;  %s1071_s15 = smov 0  }
   0x8   :  { %s1073_s16 = smov 0   ;;  %s1075_s17 = smov 0  }
   0x9   :  { %s1077_s18 = smov 0   ;;  %s1079_s19 = smov 0  }
   0xa LB: > { %s597_s20 = sadd.s32 4294967295, %s1037_s19   ;;  %p599_p0 = scmp.ge.s32.totalorder %s1037_s19, 1  ;;  %s1037_s19 = sphi %s1079_s19, %s20_s19   ;;  %s1033_s18 = sphi %s1077_s18, %s1316_s18   ;;  %s1029_s17 = sphi %s1075_s17, %s1315_s17   ;;  %s1025_s16 = sphi %s1073_s16, %s1314_s16   ;;  %s1021_s15 = sphi %s1071_s15, %s1313_s15   ;;  %s1017_s14 = sphi %s1069_s14, %s1312_s14   ;;  %s1013_s13 = sphi %s1067_s13, %s1311_s13   ;;  %s1009_s12 = sphi %s1065_s12, %s1310_s12  }
   0xb   : > { %p1109_p1 = scmp.eq.s32.totalorder %s597_s20, 0  ;;  %p131_p2 = scmp.lt.s32.totalorder %s1037_s19, 7 }
   0xc   : > { %s1304_s1 = sld [smem:[#allocation12_spill]]  ;;  %s1039_s26 = smov [#allocation5]  }
   0xd   : > { %p1117_p3 = pnand %p599_p0, %p131_p2  ;;  %s144_s27 = sshll.u32 %s1039_s26, 4  ;;  %s145_s27 = int_to_ptr.vmem [resolvable:$true] %s144_s27 }
   0xe   : > { %s156_s30 = sshll.u32 %s1300_s2, 4  ;;  %s1040_s4 = smov 192   ;;  %s157_s30 = int_to_ptr.hbm [resolvable:$true] %s156_s30 }
   0xf   : > { %p750_p4 = pneg %p1117_p3  ;;  %s1041_s5 = smov 12  }
  0x10   : > { %s1042_s6 = smov [#allocation7]   ;;  %s1043_s8 = smov 48  }
  0x11   : > { %p751_p5 = pnand %p750_p4, %p1109_p1  ;;  %s158_s7 = sshll.u32 %s1042_s6, 4  ;;  %s159_s7 = int_to_ptr.vmem [resolvable:$true] %s158_s7 }
  0x12   : > { %s142_s24 = sshll.u32 %s1304_s1, 4  ;;  %s1044_s9 = smov 3   ;;  %s143_s24 = int_to_ptr.hbm [resolvable:$true] %s142_s24 }
  0x13   : > { %753 = dma.hbm_to_vmem [thread:$0]  (!%p751_p5), %s143_s24, 9216, %s145_s27, [#allocation6], %s1040_s4, %s1040_s4, %s1041_s5  }
  0x14   : > { %756 = dma.hbm_to_vmem [thread:$0]  (!%p751_p5), %s157_s30, 144, %s159_s7, [#allocation6], %s1043_s8, %s1043_s8, %s1044_s9  }
  0x15   : > { %s29_s10 = sadd.s32 1, %s1029_s17  ;;  %s32_s11 = sadd.s32 1, %s1033_s18 }
  0x16   : > { %p30_p6 = scmp.ge.s32.totalorder %s29_s10, 3  ;;  %s598_s22 = sadd.s32 4294967294, %s1037_s19  }
  0x17   : > { %p46_p7 = scmp.ne.s32.totalorder %s1017_s14, %s1013_s13  ;;  %p47_p8 = scmp.eq.s32.totalorder %s1037_s19, 0 }
  0x18   : > { %s1318_s10 = smov (%p30_p6, %s29_s10), 0  ;;  %s1320_s11 = smov (!%p30_p6, %s32_s11), %s1033_s18 }
  0x19   : > { %p52_p9 = scmp.ne.s32.totalorder %s1013_s13, %s1009_s12  ;;  %p34_p10 = scmp.ge.s32.totalorder %s1320_s11, 2 }
  0x1a   : > { %p118_p11 = scmp.eq.s32.totalorder %s597_s20, 5  ;;  %s39_s23 = sadd.s32 1, %s1017_s14 }
  0x1b   : > { %p1144_p12 = por %p1109_p1, %p52_p9  ;;  %s1322_s11 = smov (%p34_p10, %s1320_s11), 0 }
  0x1c   : > { %p1153_p13 = por %p118_p11, %p46_p7  ;;  %p124_p0 = scmp.eq.s32.totalorder %s598_s22, 5 }
  0x1d   : > { %s36_s27 = ssub.s32 %s1033_s18, %s1322_s11  ;;  %p1162_p2 = por %p47_p8, %p46_p7 }
  0x1e   : > { %p37_p4 = scmp.eq.s32.totalorder %s36_s27, 0  ;;  %p1166_p5 = por %p124_p0, %p52_p9 }
  0x1f   : > { %s172_s29 = sand.u32 1, %s1017_s14   ;;  %s604_s30 = sshll.u32 %s1033_s18, 3 }
  0x20   : > { %s1173_s4 = scalar_select %p37_p4, %s1017_s14, %s39_s23  }
  0x21   : > { %p767_p6 = scmp.lt.s32.totalorder %s1037_s19, 6  ;;  %s603_s5 = sshll.u32 %s172_s29, 3 }
  0x22   : > { %s180_s8 = scalar_lea.hbm %s1298_s0, %s604_s30  ;;  %s176_s22 = scalar_lea.vmem [#allocation2], %s603_s5 }
  0x23   : > { %s182_s9 = sshll.u32 %s180_s8, 4  ;;  %s184_s1 = sshll.u32 %s176_s22, 4  ;;  %s183_s9 = int_to_ptr.hbm [resolvable:$true] %s182_s9  ;;  %s185_s1 = int_to_ptr.vmem [resolvable:$true] %s184_s1 }
  0x24   : > { %p758_p7 = pnand %p767_p6, %p1162_p2  ;;  %s173_s27 = scalar_lea.sflag [#allocation3], %s172_s29 }
  0x25   : > { %193 = sbr.rel (%p1117_p3) target bundleno = 254 (0xfe), region = 32  ;;  %s1184_s23 = sand.u32 (!%p1117_p3), 1, %s1013_s13  }
  0x26   : > { %760 = dma.hbm_to_vmem [thread:$0]  (!%p758_p7), %s183_s9, 128, %s185_s1, %s173_s27  }
  0x27   : > { %s606_s6 = sshll.u32 (!%p1117_p3), %s1184_s23, 3  ;;  %s196_s30 = scalar_lea.sflag (!%p1117_p3), [#allocation3], %s1184_s23 }
  0x28   : > { %s199_s7 = scalar_lea.vmem (!%p1117_p3), [#allocation2], %s606_s6 }
  0x2a   : > { %996 = dma.done.wait (%p1144_p12), %s196_s30, 128  }
  0x2b   : > { %998 = vsyncadd (%p1144_p12), %s196_s30, 4294967168 }
  0x2c   : > { %1000 = dma.done.wait (%p1109_p1), [#allocation6], 9360  }
  0x2d   : > { %1002 = vsyncadd (%p1109_p1), [#allocation6], 4294957936  ;;  %s1196_s1 = scalar_lea.vmem [#allocation8], %s606_s6  ;;  %p610_p3 = scmp.ne.s32.totalorder %s1021_s15, 0 }
  0x2f   : > { %236 = sbr.rel (%p610_p3) target bundleno = 54 (0x36), region = 48 }
  0x34   : > { %v237_v0 = vld [vmem:[%s199_s7] sm:$0xff] }
  0x35   : > { %238 = vst [vmem:[%s1196_s1] sm:$0xff] %v237_v0 }
  0x36 PF: > { %s713_s25 = smul.u32 192, %s1021_s15  ;;  %s490_s9 = sshll.u32 %s1196_s1, 4  ;;  %s491_s9 = int_to_ptr.vmem [resolvable:$true] %s490_s9 }
  0x37   : > { %s275_s21 = smul.u32 3, %s1021_s15  ;;  %s710_s15 = sshll.u32 %s1025_s16, 3 }
  0x38   : > { %s1201_s28 = scalar_lea.vmem [#allocation5], %s713_s25  ;;  %s488_s8 = scalar_lea.hbm %s1301_s3, %s710_s15 }
  0x39   : > { %v698_v1 = vld [vmem:[%s1201_s28 + $0xa8] sm:$0xf]  ;;  %v736_v2 = vld [vmem:[%s1201_s28 + $0xb0] sm:$0xf0]  ;;  %v686_v3 = vld [vmem:[%s1201_s28 + $0x90] sm:$0xf] }
  0x3a   : > { %v699_v4 = vor.u32 %v736_v2, %v698_v1  ;;  %v733_v5 = vld [vmem:[%s1201_s28 + $0x98] sm:$0xf0]  ;;  %v706_v6 = vld [vmem:[%s1201_s28 + $0xb0] sm:$0xf]  ;;  %v674_v8 = vld [vmem:[%s1201_s28 + $0x78] sm:$0xf] }
  0x3b   : > { %v687_v7 = vor.u32 %v733_v5, %v686_v3  ;;  %v730_v9 = vld [vmem:[%s1201_s28 + $0x80] sm:$0xf0]  ;;  %v737_v10 = vld [vmem:[%s1201_s28 + $0xb8] sm:$0xf0]  ;;  %v735_v12 = vld [vmem:[%s1201_s28 + $0xac] sm:$0xf] }
  0x3c   : > { %414 = vmatpush.bf16.msra.mxu0 %v699_v4  ;;  %v707_v11 = vor.u32 %v737_v10, %v706_v6  ;;  %v700_v13 = vld [vmem:[%s1201_s28 + $0xb4] sm:$0xf0]  ;;  %v734_v16 = vld [vmem:[%s1201_s28 + $0xa0] sm:$0xf0]  ;;  %v732_v18 = vld [vmem:[%s1201_s28 + $0x94] sm:$0xf]  ;;  %v675_v20 = vor.u32 %v730_v9, %v674_v8 }
  0x3d   : > { %v694_v14 = vld [vmem:[%s1201_s28 + $0x98] sm:$0xf]  ;;  %v703_v15 = vor.u32 %v735_v12, %v700_v13  ;;  %v688_v19 = vld [vmem:[%s1201_s28 + $0x9c] sm:$0xf0]  ;;  %v731_v24 = vld [vmem:[%s1201_s28 + $0x88] sm:$0xf0] }
  0x3e   : > { %440 = vmatpush.bf16.msra.mxu2 %v707_v11  ;;  %v695_v17 = vor.u32 %v734_v16, %v694_v14  ;;  %v662_v21 = vld [vmem:[%s1201_s28 + $0x60] sm:$0xf]  ;;  %v691_v22 = vor.u32 %v732_v18, %v688_v19  ;;  %v727_v25 = vld [vmem:[%s1201_s28 + $0x68] sm:$0xf0]  ;;  %v729_v26 = vld [vmem:[%s1201_s28 + $0x7c] sm:$0xf] }
  0x3f   : > { %427 = vmatpush.bf16.msra.mxu1 %v703_v15  ;;  %v682_v23 = vld [vmem:[%s1201_s28 + $0x80] sm:$0xf]  ;;  %v676_v27 = vld [vmem:[%s1201_s28 + $0x84] sm:$0xf0]  ;;  %v663_v29 = vor.u32 %v727_v25, %v662_v21  ;;  %v728_v33 = vld [vmem:[%s1201_s28 + $0x70] sm:$0xf0] }
  0x40   : > { %415 = vmatpush.bf16.msra.mxu0 %v687_v7  ;;  %v683_v28 = vor.u32 %v731_v24, %v682_v23  ;;  %v650_v30 = vld [vmem:[%s1201_s28 + $0x48] sm:$0xf]  ;;  %v679_v31 = vor.u32 %v729_v26, %v676_v27  ;;  %v724_v34 = vld [vmem:[%s1201_s28 + $0x50] sm:$0xf0]  ;;  %v726_v35 = vld [vmem:[%s1201_s28 + $0x64] sm:$0xf] }
  0x41   : > { %v670_v32 = vld [vmem:[%s1201_s28 + $0x68] sm:$0xf]  ;;  %v664_v36 = vld [vmem:[%s1201_s28 + $0x6c] sm:$0xf0]  ;;  %v651_v38 = vor.u32 %v724_v34, %v650_v30  ;;  %v725_v42 = vld [vmem:[%s1201_s28 + $0x58] sm:$0xf0] }
  0x42   : > { %441 = vmatpush.bf16.msra.mxu2 %v695_v17  ;;  %v671_v37 = vor.u32 %v728_v33, %v670_v32  ;;  %v638_v39 = vld [vmem:[%s1201_s28 + $0x30] sm:$0xf]  ;;  %v667_v40 = vor.u32 %v726_v35, %v664_v36  ;;  %v721_v43 = vld [vmem:[%s1201_s28 + $0x38] sm:$0xf0]  ;;  %v723_v44 = vld [vmem:[%s1201_s28 + $0x4c] sm:$0xf] }
  0x43   : > { %428 = vmatpush.bf16.msra.mxu1 %v691_v22  ;;  %v658_v41 = vld [vmem:[%s1201_s28 + $0x50] sm:$0xf]  ;;  %v652_v45 = vld [vmem:[%s1201_s28 + $0x54] sm:$0xf0]  ;;  %v639_v47 = vor.u32 %v721_v43, %v638_v39  ;;  %v722_v51 = vld [vmem:[%s1201_s28 + $0x40] sm:$0xf0] }
  0x44   : > { %416 = vmatpush.bf16.msra.mxu0 %v675_v20  ;;  %v659_v46 = vor.u32 %v725_v42, %v658_v41  ;;  %v626_v48 = vld [vmem:[%s1201_s28 + $0x18] sm:$0xf]  ;;  %v655_v49 = vor.u32 %v723_v44, %v652_v45  ;;  %v718_v52 = vld [vmem:[%s1201_s28 + $0x20] sm:$0xf0]  ;;  %v720_v53 = vld [vmem:[%s1201_s28 + $0x34] sm:$0xf] }
  0x45   : > { %v646_v50 = vld [vmem:[%s1201_s28 + $0x38] sm:$0xf]  ;;  %v640_v54 = vld [vmem:[%s1201_s28 + $0x3c] sm:$0xf0]  ;;  %v627_v56 = vor.u32 %v718_v52, %v626_v48  ;;  %v719_v60 = vld [vmem:[%s1201_s28 + $0x28] sm:$0xf0] }
  0x46   : > { %442 = vmatpush.bf16.msra.mxu2 %v683_v28  ;;  %v647_v55 = vor.u32 %v722_v51, %v646_v50  ;;  %v614_v57 = vld [vmem:[%s1201_s28] sm:$0xf]  ;;  %v643_v58 = vor.u32 %v720_v53, %v640_v54  ;;  %v715_v61 = vld [vmem:[%s1201_s28 + $0x8] sm:$0xf0]  ;;  %v717_v62 = vld [vmem:[%s1201_s28 + $0x1c] sm:$0xf] }
  0x47   : > { %429 = vmatpush.bf16.msra.mxu1 %v679_v31  ;;  %v634_v59 = vld [vmem:[%s1201_s28 + $0x20] sm:$0xf]  ;;  %v628_v63 = vld [vmem:[%s1201_s28 + $0x24] sm:$0xf0]  ;;  %v615_v1 = vor.u32 %v715_v61, %v614_v57  ;;  %v716_v5 = vld [vmem:[%s1201_s28 + $0x10] sm:$0xf0] }
  0x48   : > { %417 = vmatpush.bf16.msra.mxu0 %v663_v29  ;;  %v635_v0 = vor.u32 %v719_v60, %v634_v59  ;;  %v239_v2 = vld [vmem:[%s1196_s1] sm:$0xff]  ;;  %v631_v3 = vor.u32 %v717_v62, %v628_v63  ;;  %v616_v7 = vld [vmem:[%s1201_s28 + $0xc] sm:$0xf0]  ;;  %s276_s24 = scalar_lea.vmem [#allocation7], %s275_s21  ;;  %s492_s16 = sshll.u32 %s488_s8, 4  ;;  %s493_s16 = int_to_ptr.hbm [resolvable:$true] %s492_s16 }
  0x49   : > { %v622_v4 = vld [vmem:[%s1201_s28 + $0x8] sm:$0xf]  ;;  %v714_v6 = vld [vmem:[%s1201_s28 + $0x4] sm:$0xf]  ;;  %v278_v8 = vpack.c.bf16 %v239_v2, %v239_v2  ;;  %v277_v11 = vld [vmem:[%s276_s24] sm:$0x7] }
  0x4a   : > { %443 = vmatpush.bf16.msra.mxu2 %v671_v37  ;;  %v623_v9 = vor.u32 %v716_v5, %v622_v4  ;;  %v619_v10 = vor.u32 %v714_v6, %v616_v7  ;;  %v280_v12 = vperm.slane %v277_v11, 0  ;;  %v281_v22 = vperm.slane %v277_v11, 1  ;;  %s478_s22 = scalar_lea.sflag [#allocation4], %s1184_s23  ;;  %s949_s27 = sshra.s32 %s493_s16, 4  ;;  %s950_s27 = int_to_ptr.hbm [resolvable:$true] %s949_s27 }
  0x4b   : > { %430 = vmatpush.bf16.msra.mxu1 %v667_v40  ;;  %v282_v25 = vperm.slane %v277_v11, 2  ;;  %s951_s6 = scalar_lea.hbm %s950_s27, 8  ;;  %s955_s25 = scalar_lea.hbm %s1301_s3, 16 }
  0x4c   : > { %418 = vmatpush.bf16.msra.mxu0 %v651_v38  ;;  %p952_p1 = scmp.ne.s32.totalorder %s950_s27, %s951_s6  ;;  %p956_p10 = scmp.lt.s32.totalorder %s950_s27, %s1301_s3 }
  0x4d   : > { %p957_p11 = scmp.lt.s32.totalorder %s955_s25, %s951_s6 }
  0x4e   : > { %444 = vmatpush.bf16.msra.mxu2 %v659_v46  ;;  %p953_p8 = pnand %p952_p1, %p1153_p13 }
  0x4f   : > { %431 = vmatpush.bf16.msra.mxu1 %v655_v49  ;;  %p958_p12 = por %p957_p11, %p956_p10 }
  0x50   : > { %419 = vmatpush.bf16.msra.mxu0 %v639_v47  ;;  %p954_p9 = pneg %p953_p8 }
  0x52   : > { %445 = vmatpush.bf16.msra.mxu2 %v647_v55  ;;  %p959_p0 = pnand %p958_p12, %p954_p9 }
  0x53   : > { %432 = vmatpush.bf16.msra.mxu1 %v643_v58 }
  0x54   : > { %420 = vmatpush.bf16.msra.mxu0 %v627_v56 }
  0x56   : > { %446 = vmatpush.bf16.msra.mxu2 %v635_v0 }
  0x57   : > { %433 = vmatpush.bf16.msra.mxu1 %v631_v3 }
  0x58   : > { %421 = vmatpush.bf16.msra.mxu0 %v615_v1 }
  0x5a   : > { %447 = vmatpush.bf16.msra.mxu2 %v623_v9 }
  0x5b   : > { %422 = vmatmul.bf16.vlgmr.msra.gmra.mxu0 %v278_v8  ;;  %434 = vmatpush.bf16.msra.mxu1 %v619_v10 }
  0x5d   : > { %448 = vmatmul.bf16.vlgmr.msra.gmra.mxu2 %v278_v8 }
  0x5e   : > { %435 = vmatmul.bf16.vlgmr.msra.gmra.mxu1 %v278_v8 }
  0xd8   : > { %v423_v13 = vpop.f32.mrf.mxu0 }
  0xd9   : > { %v424_v14 = vadd.f32 %v423_v13, %v280_v12 }
  0xdb   : > { %v708_v15 = vmul.f32 -1.442695, %v424_v14  ;;  %v436_v16 = vpop.f32.mrf.mxu1 }
  0xdc   : > { %v437_v24 = vadd.f32 %v436_v16, %v281_v22 }
  0xdd   : > { %841 = vpow2.f32 %v708_v15 }
  0xde   : > { %v472_v28 = vmax.f32 %v437_v24, 0.0 }
  0xe0   : > { %v425_v17 = vpop.f32.mrf.mxu0  ;;  %v449_v18 = vpop.f32.mrf.mxu2 }
  0xe1   : > { %v450_v29 = vadd.f32 %v449_v18, %v282_v25 }
  0xe3   : > { %v842_v19 = vpop.eup %841  ;;  %v438_v21 = vpop.f32.mrf.mxu1  ;;  %v473_v35 = vsub.f32 %v472_v28, %v450_v29 }
  0xe4   : > { %v456_v20 = vadd.f32 1.0, %v842_v19 }
  0xe6   : > { %843 = vrcp.f32 %v456_v20  ;;  %v468_v31 = vand.u32 2147483648, %v456_v20  ;;  %v466_v33 = vand.u32 2147483647, %v456_v20  ;;  %vm462_vm1 = vweird.f32 %v456_v20 }
  0xe8   : > { %v451_v23 = vpop.f32.mrf.mxu2  ;;  %v469_v36 = vor.u32 1.1754944e-38, %v468_v31  ;;  %vm467_vm3 = vcmp.eq.f32.partialorder %v466_v33, 8.507059e+37 }
  0xec   : > { %v844_v26 = vpop.eup %843 }
  0xed   : > { %v458_v27 = vmul.f32 %v844_v26, %v456_v20  ;;  %vm463_vm0 = vweird.f32 %v844_v26 }
  0xee   : > { %vm464_vm2 = vmor %vm462_vm1, %vm463_vm0 }
  0xef   : > { %v459_v30 = vsub.f32 1.0, %v458_v27 }
  0xf1   : > { %v460_v32 = vmul.f32 %v844_v26, %v459_v30 }
  0xf3   : > { %v461_v34 = vadd.f32 %v844_v26, %v460_v32 }
  0xf5   : > { %v465_v37 = vsel %vm464_vm2, %v844_v26, %v461_v34 }
  0xf6   : > { %v470_v38 = vsel %vm467_vm3, %v469_v36, %v465_v37 }
  0xf7   : > { %v474_v39 = vmul.f32 %v473_v35, %v470_v38 }
  0xf9   : > { %v475_v40 = vadd.f32 %v474_v39, %v450_v29 }
  0xfb   : > { %476 = vst [vmem:[%s1196_s1] sm:$0xff] %v475_v40 }
  0xfc   : > { %962 = shalt.err (!%p959_p0)
}
  0xfd   : > { %748 = dma.vmem_to_hbm [thread:$0]  (%p1153_p13), %s491_s9, 128, %s493_s16, %s478_s22  }
  0xfe PF: > { %p770_p2 = scmp.ge.s32.totalorder %s1037_s19, 2  ;;  %s504_s23 = sand.u32 1, %s1009_s12  }
  0xff   : > { %s505_s1 = scalar_lea.sflag [#allocation4], %s504_s23 }
 0x100   : > { %p762_p4 = pnand %p770_p2, %p1166_p5 }
 0x102   : > { %p763_p6 = pneg %p762_p4 }
 0x104   : > { %1004 = dma.done.wait (%p763_p6), %s505_s1, 128  }
 0x105   : > { %1006 = vsyncadd (%p763_p6), %s505_s1, 4294967168  ;;  %s20_s19 = sadd.s32 1, %s1037_s19   ;;  %s1310_s12 = smov %s1013_s13 }
 0x106   : > { %p17_p7 = scmp.ge.s32.totalorder %s20_s19, 8   ;;  %s1311_s13 = smov %s1017_s14 }
 0x107   : > { %s1312_s14 = smov %s1173_s4  ;;  %s1313_s15 = smov %s1029_s17 }
 0x108   : > { %s1314_s16 = smov %s1033_s18  ;;  %s1315_s17 = smov %s1318_s10 }
 0x109   : > { %s1316_s18 = smov %s1322_s11  ;;  %19 = sbr.rel (!%p17_p7) target bundleno = 10 (0xa), region = 91 }
 0x10e   :  { %511 = vsyncpa [#allocation3], 1 }
 0x10f   :  { %513 = vsyncpa [#allocation3 + $0x1], 1 }
 0x110   :  { %514 = vsyncpa [#allocation6], 1 }
 0x111   :  { %515 = vsyncpa [#allocation4], 1 }
 0x112   :  { %517 = vsyncpa [#allocation4 + $0x1], 1 }

// kernel: tpu_custom_call.1
= control target key start
LH: loop header
LB: loop body
LE: loop exit
PB: predicated region body
PF: predicated region fallthrough
CT: control target
= control target key end

     0   :  { %s1298_s0 = inlined_call_operand.hbm [shape: f32[16,128], index: 0, kind: input, shape index: {}]   ;;  %s1299_s1 = inlined_call_operand.hbm [shape: bf16[3,128,384], index: 1, kind: input, shape index: {}]   ;;  %s1300_s2 = inlined_call_operand.hbm [shape: f32[3,1,384], index: 2, kind: input, shape index: {}]   ;;  %s1301_s3 = inlined_call_operand.hbm [shape: f32[16,128], index: 3, kind: output, shape index: {}]  }
   0x1   :  { %1302 = sst [smem:[#allocation12_spill]] %s1299_s1 }
   0x2   :  { %8 = vsyncpa [#allocation3], 0 }
   0x3   :  { %10 = vsyncpa [#allocation3 + $0x1], 0 }
   0x4   :  { %11 = vsyncpa [#allocation6], 0 }
   0x5   :  { %12 = vsyncpa [#allocation4], 0 }
   0x6   :  { %14 = vsyncpa [#allocation4 + $0x1], 0  ;;  %s1065_s12 = smov 0   ;;  %s1067_s13 = smov 0  }
   0x7   :  { %s1069_s14 = smov 0   ;;  %s1071_s15 = smov 0  }
   0x8   :  { %s1073_s16 = smov 0   ;;  %s1075_s17 = smov 0  }
   0x9   :  { %s1077_s18 = smov 0   ;;  %s1079_s19 = smov 0  }
   0xa LB: > { %s597_s20 = sadd.s32 4294967295, %s1037_s19   ;;  %p599_p0 = scmp.ge.s32.totalorder %s1037_s19, 1  ;;  %s1037_s19 = sphi %s1079_s19, %s20_s19   ;;  %s1033_s18 = sphi %s1077_s18, %s1316_s18   ;;  %s1029_s17 = sphi %s1075_s17, %s1315_s17   ;;  %s1025_s16 = sphi %s1073_s16, %s1314_s16   ;;  %s1021_s15 = sphi %s1071_s15, %s1313_s15   ;;  %s1017_s14 = sphi %s1069_s14, %s1312_s14   ;;  %s1013_s13 = sphi %s1067_s13, %s1311_s13   ;;  %s1009_s12 = sphi %s1065_s12, %s1310_s12  }
   0xb   : > { %p1109_p1 = scmp.eq.s32.totalorder %s597_s20, 0  ;;  %p131_p2 = scmp.lt.s32.totalorder %s1037_s19, 7 }
   0xc   : > { %s1304_s1 = sld [smem:[#allocation12_spill]]  ;;  %s1039_s26 = smov [#allocation5]  }
   0xd   : > { %p1117_p3 = pnand %p599_p0, %p131_p2  ;;  %s144_s27 = sshll.u32 %s1039_s26, 4  ;;  %s145_s27 = int_to_ptr.vmem [resolvable:$true] %s144_s27 }
   0xe   : > { %s156_s30 = sshll.u32 %s1300_s2, 4  ;;  %s1040_s4 = smov 192   ;;  %s157_s30 = int_to_ptr.hbm [resolvable:$true] %s156_s30 }
   0xf   : > { %p750_p4 = pneg %p1117_p3  ;;  %s1041_s5 = smov 12  }
  0x10   : > { %s1042_s6 = smov [#allocation7]   ;;  %s1043_s8 = smov 48  }
  0x11   : > { %p751_p5 = pnand %p750_p4, %p1109_p1  ;;  %s158_s7 = sshll.u32 %s1042_s6, 4  ;;  %s159_s7 = int_to_ptr.vmem [resolvable:$true] %s158_s7 }
  0x12   : > { %s142_s24 = sshll.u32 %s1304_s1, 4  ;;  %s1044_s9 = smov 3   ;;  %s143_s24 = int_to_ptr.hbm [resolvable:$true] %s142_s24 }
  0x13   : > { %753 = dma.hbm_to_vmem [thread:$0]  (!%p751_p5), %s143_s24, 9216, %s145_s27, [#allocation6], %s1040_s4, %s1040_s4, %s1041_s5  }
  0x14   : > { %756 = dma.hbm_to_vmem [thread:$0]  (!%p751_p5), %s157_s30, 144, %s159_s7, [#allocation6], %s1043_s8, %s1043_s8, %s1044_s9  }
  0x15   : > { %s29_s10 = sadd.s32 1, %s1029_s17  ;;  %s32_s11 = sadd.s32 1, %s1033_s18 }
  0x16   : > { %p30_p6 = scmp.ge.s32.totalorder %s29_s10, 3  ;;  %s598_s22 = sadd.s32 4294967294, %s1037_s19  }
  0x17   : > { %p46_p7 = scmp.ne.s32.totalorder %s1017_s14, %s1013_s13  ;;  %p47_p8 = scmp.eq.s32.totalorder %s1037_s19, 0 }
  0x18   : > { %s1318_s10 = smov (%p30_p6, %s29_s10), 0  ;;  %s1320_s11 = smov (!%p30_p6, %s32_s11), %s1033_s18 }
  0x19   : > { %p52_p9 = scmp.ne.s32.totalorder %s1013_s13, %s1009_s12  ;;  %p34_p10 = scmp.ge.s32.totalorder %s1320_s11, 2 }
  0x1a   : > { %p118_p11 = scmp.eq.s32.totalorder %s597_s20, 5  ;;  %s39_s23 = sadd.s32 1, %s1017_s14 }
  0x1b   : > { %p1144_p12 = por %p1109_p1, %p52_p9  ;;  %s1322_s11 = smov (%p34_p10, %s1320_s11), 0 }
  0x1c   : > { %p1153_p13 = por %p118_p11, %p46_p7  ;;  %p124_p0 = scmp.eq.s32.totalorder %s598_s22, 5 }
  0x1d   : > { %s36_s27 = ssub.s32 %s1033_s18, %s1322_s11  ;;  %p1162_p2 = por %p47_p8, %p46_p7 }
  0x1e   : > { %p37_p4 = scmp.eq.s32.totalorder %s36_s27, 0  ;;  %p1166_p5 = por %p124_p0, %p52_p9 }
  0x1f   : > { %s172_s29 = sand.u32 1, %s1017_s14   ;;  %s604_s30 = sshll.u32 %s1033_s18, 3 }
  0x20   : > { %s1173_s4 = scalar_select %p37_p4, %s1017_s14, %s39_s23  }
  0x21   : > { %p767_p6 = scmp.lt.s32.totalorder %s1037_s19, 6  ;;  %s603_s5 = sshll.u32 %s172_s29, 3 }
  0x22   : > { %s180_s8 = scalar_lea.hbm %s1298_s0, %s604_s30  ;;  %s176_s22 = scalar_lea.vmem [#allocation2], %s603_s5 }
  0x23   : > { %s182_s9 = sshll.u32 %s180_s8, 4  ;;  %s184_s1 = sshll.u32 %s176_s22, 4  ;;  %s183_s9 = int_to_ptr.hbm [resolvable:$true] %s182_s9  ;;  %s185_s1 = int_to_ptr.vmem [resolvable:$true] %s184_s1 }
  0x24   : > { %p758_p7 = pnand %p767_p6, %p1162_p2  ;;  %s173_s27 = scalar_lea.sflag [#allocation3], %s172_s29 }
  0x25   : > { %193 = sbr.rel (%p1117_p3) target bundleno = 254 (0xfe), region = 32  ;;  %s1184_s23 = sand.u32 (!%p1117_p3), 1, %s1013_s13  }
  0x26   : > { %760 = dma.hbm_to_vmem [thread:$0]  (!%p758_p7), %s183_s9, 128, %s185_s1, %s173_s27  }
  0x27   : > { %s606_s6 = sshll.u32 (!%p1117_p3), %s1184_s23, 3  ;;  %s196_s30 = scalar_lea.sflag (!%p1117_p3), [#allocation3], %s1184_s23 }
  0x28   : > { %s199_s7 = scalar_lea.vmem (!%p1117_p3), [#allocation2], %s606_s6 }
  0x2a   : > { %996 = dma.done.wait (%p1144_p12), %s196_s30, 128  }
  0x2b   : > { %998 = vsyncadd (%p1144_p12), %s196_s30, 4294967168 }
  0x2c   : > { %1000 = dma.done.wait (%p1109_p1), [#allocation6], 9360  }
  0x2d   : > { %1002 = vsyncadd (%p1109_p1), [#allocation6], 4294957936  ;;  %s1196_s1 = scalar_lea.vmem [#allocation8], %s606_s6  ;;  %p610_p3 = scmp.ne.s32.totalorder %s1021_s15, 0 }
  0x2f   : > { %236 = sbr.rel (%p610_p3) target bundleno = 54 (0x36), region = 48 }
  0x34   : > { %v237_v0 = vld [vmem:[%s199_s7] sm:$0xff] }
  0x35   : > { %238 = vst [vmem:[%s1196_s1] sm:$0xff] %v237_v0 }
  0x36 PF: > { %s713_s25 = smul.u32 192, %s1021_s15  ;;  %s490_s9 = sshll.u32 %s1196_s1, 4  ;;  %s491_s9 = int_to_ptr.vmem [resolvable:$true] %s490_s9 }
  0x37   : > { %s275_s21 = smul.u32 3, %s1021_s15  ;;  %s710_s15 = sshll.u32 %s1025_s16, 3 }
  0x38   : > { %s1201_s28 = scalar_lea.vmem [#allocation5], %s713_s25  ;;  %s488_s8 = scalar_lea.hbm %s1301_s3, %s710_s15 }
  0x39   : > { %v698_v1 = vld [vmem:[%s1201_s28 + $0xa8] sm:$0xf]  ;;  %v736_v2 = vld [vmem:[%s1201_s28 + $0xb0] sm:$0xf0]  ;;  %v686_v3 = vld [vmem:[%s1201_s28 + $0x90] sm:$0xf] }
  0x3a   : > { %v699_v4 = vor.u32 %v736_v2, %v698_v1  ;;  %v733_v5 = vld [vmem:[%s1201_s28 + $0x98] sm:$0xf0]  ;;  %v706_v6 = vld [vmem:[%s1201_s28 + $0xb0] sm:$0xf]  ;;  %v674_v8 = vld [vmem:[%s1201_s28 + $0x78] sm:$0xf] }
  0x3b   : > { %v687_v7 = vor.u32 %v733_v5, %v686_v3  ;;  %v730_v9 = vld [vmem:[%s1201_s28 + $0x80] sm:$0xf0]  ;;  %v737_v10 = vld [vmem:[%s1201_s28 + $0xb8] sm:$0xf0]  ;;  %v735_v12 = vld [vmem:[%s1201_s28 + $0xac] sm:$0xf] }
  0x3c   : > { %414 = vmatpush.bf16.msra.mxu0 %v699_v4  ;;  %v707_v11 = vor.u32 %v737_v10, %v706_v6  ;;  %v700_v13 = vld [vmem:[%s1201_s28 + $0xb4] sm:$0xf0]  ;;  %v734_v16 = vld [vmem:[%s1201_s28 + $0xa0] sm:$0xf0]  ;;  %v732_v18 = vld [vmem:[%s1201_s28 + $0x94] sm:$0xf]  ;;  %v675_v20 = vor.u32 %v730_v9, %v674_v8 }
  0x3d   : > { %v694_v14 = vld [vmem:[%s1201_s28 + $0x98] sm:$0xf]  ;;  %v703_v15 = vor.u32 %v735_v12, %v700_v13  ;;  %v688_v19 = vld [vmem:[%s1201_s28 + $0x9c] sm:$0xf0]  ;;  %v731_v24 = vld [vmem:[%s1201_s28 + $0x88] sm:$0xf0] }
  0x3e   : > { %440 = vmatpush.bf16.msra.mxu2 %v707_v11  ;;  %v695_v17 = vor.u32 %v734_v16, %v694_v14  ;;  %v662_v21 = vld [vmem:[%s1201_s28 + $0x60] sm:$0xf]  ;;  %v691_v22 = vor.u32 %v732_v18, %v688_v19  ;;  %v727_v25 = vld [vmem:[%s1201_s28 + $0x68] sm:$0xf0]  ;;  %v729_v26 = vld [vmem:[%s1201_s28 + $0x7c] sm:$0xf] }
  0x3f   : > { %427 = vmatpush.bf16.msra.mxu1 %v703_v15  ;;  %v682_v23 = vld [vmem:[%s1201_s28 + $0x80] sm:$0xf]  ;;  %v676_v27 = vld [vmem:[%s1201_s28 + $0x84] sm:$0xf0]  ;;  %v663_v29 = vor.u32 %v727_v25, %v662_v21  ;;  %v728_v33 = vld [vmem:[%s1201_s28 + $0x70] sm:$0xf0] }
  0x40   : > { %415 = vmatpush.bf16.msra.mxu0 %v687_v7  ;;  %v683_v28 = vor.u32 %v731_v24, %v682_v23  ;;  %v650_v30 = vld [vmem:[%s1201_s28 + $0x48] sm:$0xf]  ;;  %v679_v31 = vor.u32 %v729_v26, %v676_v27  ;;  %v724_v34 = vld [vmem:[%s1201_s28 + $0x50] sm:$0xf0]  ;;  %v726_v35 = vld [vmem:[%s1201_s28 + $0x64] sm:$0xf] }
  0x41   : > { %v670_v32 = vld [vmem:[%s1201_s28 + $0x68] sm:$0xf]  ;;  %v664_v36 = vld [vmem:[%s1201_s28 + $0x6c] sm:$0xf0]  ;;  %v651_v38 = vor.u32 %v724_v34, %v650_v30  ;;  %v725_v42 = vld [vmem:[%s1201_s28 + $0x58] sm:$0xf0] }
  0x42   : > { %441 = vmatpush.bf16.msra.mxu2 %v695_v17  ;;  %v671_v37 = vor.u32 %v728_v33, %v670_v32  ;;  %v638_v39 = vld [vmem:[%s1201_s28 + $0x30] sm:$0xf]  ;;  %v667_v40 = vor.u32 %v726_v35, %v664_v36  ;;  %v721_v43 = vld [vmem:[%s1201_s28 + $0x38] sm:$0xf0]  ;;  %v723_v44 = vld [vmem:[%s1201_s28 + $0x4c] sm:$0xf] }
  0x43   : > { %428 = vmatpush.bf16.msra.mxu1 %v691_v22  ;;  %v658_v41 = vld [vmem:[%s1201_s28 + $0x50] sm:$0xf]  ;;  %v652_v45 = vld [vmem:[%s1201_s28 + $0x54] sm:$0xf0]  ;;  %v639_v47 = vor.u32 %v721_v43, %v638_v39  ;;  %v722_v51 = vld [vmem:[%s1201_s28 + $0x40] sm:$0xf0] }
  0x44   : > { %416 = vmatpush.bf16.msra.mxu0 %v675_v20  ;;  %v659_v46 = vor.u32 %v725_v42, %v658_v41  ;;  %v626_v48 = vld [vmem:[%s1201_s28 + $0x18] sm:$0xf]  ;;  %v655_v49 = vor.u32 %v723_v44, %v652_v45  ;;  %v718_v52 = vld [vmem:[%s1201_s28 + $0x20] sm:$0xf0]  ;;  %v720_v53 = vld [vmem:[%s1201_s28 + $0x34] sm:$0xf] }
  0x45   : > { %v646_v50 = vld [vmem:[%s1201_s28 + $0x38] sm:$0xf]  ;;  %v640_v54 = vld [vmem:[%s1201_s28 + $0x3c] sm:$0xf0]  ;;  %v627_v56 = vor.u32 %v718_v52, %v626_v48  ;;  %v719_v60 = vld [vmem:[%s1201_s28 + $0x28] sm:$0xf0] }
  0x46   : > { %442 = vmatpush.bf16.msra.mxu2 %v683_v28  ;;  %v647_v55 = vor.u32 %v722_v51, %v646_v50  ;;  %v614_v57 = vld [vmem:[%s1201_s28] sm:$0xf]  ;;  %v643_v58 = vor.u32 %v720_v53, %v640_v54  ;;  %v715_v61 = vld [vmem:[%s1201_s28 + $0x8] sm:$0xf0]  ;;  %v717_v62 = vld [vmem:[%s1201_s28 + $0x1c] sm:$0xf] }
  0x47   : > { %429 = vmatpush.bf16.msra.mxu1 %v679_v31  ;;  %v634_v59 = vld [vmem:[%s1201_s28 + $0x20] sm:$0xf]  ;;  %v628_v63 = vld [vmem:[%s1201_s28 + $0x24] sm:$0xf0]  ;;  %v615_v1 = vor.u32 %v715_v61, %v614_v57  ;;  %v716_v5 = vld [vmem:[%s1201_s28 + $0x10] sm:$0xf0] }
  0x48   : > { %417 = vmatpush.bf16.msra.mxu0 %v663_v29  ;;  %v635_v0 = vor.u32 %v719_v60, %v634_v59  ;;  %v239_v2 = vld [vmem:[%s1196_s1] sm:$0xff]  ;;  %v631_v3 = vor.u32 %v717_v62, %v628_v63  ;;  %v616_v7 = vld [vmem:[%s1201_s28 + $0xc] sm:$0xf0]  ;;  %s276_s24 = scalar_lea.vmem [#allocation7], %s275_s21  ;;  %s492_s16 = sshll.u32 %s488_s8, 4  ;;  %s493_s16 = int_to_ptr.hbm [resolvable:$true] %s492_s16 }
  0x49   : > { %v622_v4 = vld [vmem:[%s1201_s28 + $0x8] sm:$0xf]  ;;  %v714_v6 = vld [vmem:[%s1201_s28 + $0x4] sm:$0xf]  ;;  %v278_v8 = vpack.c.bf16 %v239_v2, %v239_v2  ;;  %v277_v11 = vld [vmem:[%s276_s24] sm:$0x7] }
  0x4a   : > { %443 = vmatpush.bf16.msra.mxu2 %v671_v37  ;;  %v623_v9 = vor.u32 %v716_v5, %v622_v4  ;;  %v619_v10 = vor.u32 %v714_v6, %v616_v7  ;;  %v280_v12 = vperm.slane %v277_v11, 0  ;;  %v281_v22 = vperm.slane %v277_v11, 1  ;;  %s478_s22 = scalar_lea.sflag [#allocation4], %s1184_s23  ;;  %s949_s27 = sshra.s32 %s493_s16, 4  ;;  %s950_s27 = int_to_ptr.hbm [resolvable:$true] %s949_s27 }
  0x4b   : > { %430 = vmatpush.bf16.msra.mxu1 %v667_v40  ;;  %v282_v25 = vperm.slane %v277_v11, 2  ;;  %s951_s6 = scalar_lea.hbm %s950_s27, 8  ;;  %s955_s25 = scalar_lea.hbm %s1301_s3, 16 }
  0x4c   : > { %418 = vmatpush.bf16.msra.mxu0 %v651_v38  ;;  %p952_p1 = scmp.ne.s32.totalorder %s950_s27, %s951_s6  ;;  %p956_p10 = scmp.lt.s32.totalorder %s950_s27, %s1301_s3 }
  0x4d   : > { %p957_p11 = scmp.lt.s32.totalorder %s955_s25, %s951_s6 }
  0x4e   : > { %444 = vmatpush.bf16.msra.mxu2 %v659_v46  ;;  %p953_p8 = pnand %p952_p1, %p1153_p13 }
  0x4f   : > { %431 = vmatpush.bf16.msra.mxu1 %v655_v49  ;;  %p958_p12 = por %p957_p11, %p956_p10 }
  0x50   : > { %419 = vmatpush.bf16.msra.mxu0 %v639_v47  ;;  %p954_p9 = pneg %p953_p8 }
  0x52   : > { %445 = vmatpush.bf16.msra.mxu2 %v647_v55  ;;  %p959_p0 = pnand %p958_p12, %p954_p9 }
  0x53   : > { %432 = vmatpush.bf16.msra.mxu1 %v643_v58 }
  0x54   : > { %420 = vmatpush.bf16.msra.mxu0 %v627_v56 }
  0x56   : > { %446 = vmatpush.bf16.msra.mxu2 %v635_v0 }
  0x57   : > { %433 = vmatpush.bf16.msra.mxu1 %v631_v3 }
  0x58   : > { %421 = vmatpush.bf16.msra.mxu0 %v615_v1 }
  0x5a   : > { %447 = vmatpush.bf16.msra.mxu2 %v623_v9 }
  0x5b   : > { %422 = vmatmul.bf16.vlgmr.msra.gmra.mxu0 %v278_v8  ;;  %434 = vmatpush.bf16.msra.mxu1 %v619_v10 }
  0x5d   : > { %448 = vmatmul.bf16.vlgmr.msra.gmra.mxu2 %v278_v8 }
  0x5e   : > { %435 = vmatmul.bf16.vlgmr.msra.gmra.mxu1 %v278_v8 }
  0xd8   : > { %v423_v13 = vpop.f32.mrf.mxu0 }
  0xd9   : > { %v424_v14 = vadd.f32 %v423_v13, %v280_v12 }
  0xdb   : > { %v708_v15 = vmul.f32 -1.442695, %v424_v14  ;;  %v436_v16 = vpop.f32.mrf.mxu1 }
  0xdc   : > { %v437_v24 = vadd.f32 %v436_v16, %v281_v22 }
  0xdd   : > { %841 = vpow2.f32 %v708_v15 }
  0xde   : > { %v472_v28 = vmax.f32 %v437_v24, 0.0 }
  0xe0   : > { %v425_v17 = vpop.f32.mrf.mxu0  ;;  %v449_v18 = vpop.f32.mrf.mxu2 }
  0xe1   : > { %v450_v29 = vadd.f32 %v449_v18, %v282_v25 }
  0xe3   : > { %v842_v19 = vpop.eup %841  ;;  %v438_v21 = vpop.f32.mrf.mxu1  ;;  %v473_v35 = vsub.f32 %v472_v28, %v450_v29 }
  0xe4   : > { %v456_v20 = vadd.f32 1.0, %v842_v19 }
  0xe6   : > { %843 = vrcp.f32 %v456_v20  ;;  %v468_v31 = vand.u32 2147483648, %v456_v20  ;;  %v466_v33 = vand.u32 2147483647, %v456_v20  ;;  %vm462_vm1 = vweird.f32 %v456_v20 }
  0xe8   : > { %v451_v23 = vpop.f32.mrf.mxu2  ;;  %v469_v36 = vor.u32 1.1754944e-38, %v468_v31  ;;  %vm467_vm3 = vcmp.eq.f32.partialorder %v466_v33, 8.507059e+37 }
  0xec   : > { %v844_v26 = vpop.eup %843 }
  0xed   : > { %v458_v27 = vmul.f32 %v844_v26, %v456_v20  ;;  %vm463_vm0 = vweird.f32 %v844_v26 }
  0xee   : > { %vm464_vm2 = vmor %vm462_vm1, %vm463_vm0 }
  0xef   : > { %v459_v30 = vsub.f32 1.0, %v458_v27 }
  0xf1   : > { %v460_v32 = vmul.f32 %v844_v26, %v459_v30 }
  0xf3   : > { %v461_v34 = vadd.f32 %v844_v26, %v460_v32 }
  0xf5   : > { %v465_v37 = vsel %vm464_vm2, %v844_v26, %v461_v34 }
  0xf6   : > { %v470_v38 = vsel %vm467_vm3, %v469_v36, %v465_v37 }
  0xf7   : > { %v474_v39 = vmul.f32 %v473_v35, %v470_v38 }
  0xf9   : > { %v475_v40 = vadd.f32 %v474_v39, %v450_v29 }
  0xfb   : > { %476 = vst [vmem:[%s1196_s1] sm:$0xff] %v475_v40 }
  0xfc   : > { %962 = shalt.err (!%p959_p0)
}
  0xfd   : > { %748 = dma.vmem_to_hbm [thread:$0]  (%p1153_p13), %s491_s9, 128, %s493_s16, %s478_s22  }
  0xfe PF: > { %p770_p2 = scmp.ge.s32.totalorder %s1037_s19, 2  ;;  %s504_s23 = sand.u32 1, %s1009_s12  }
  0xff   : > { %s505_s1 = scalar_lea.sflag [#allocation4], %s504_s23 }
 0x100   : > { %p762_p4 = pnand %p770_p2, %p1166_p5 }
 0x102   : > { %p763_p6 = pneg %p762_p4 }
 0x104   : > { %1004 = dma.done.wait (%p763_p6), %s505_s1, 128  }
 0x105   : > { %1006 = vsyncadd (%p763_p6), %s505_s1, 4294967168  ;;  %s20_s19 = sadd.s32 1, %s1037_s19   ;;  %s1310_s12 = smov %s1013_s13 }
 0x106   : > { %p17_p7 = scmp.ge.s32.totalorder %s20_s19, 8   ;;  %s1311_s13 = smov %s1017_s14 }
 0x107   : > { %s1312_s14 = smov %s1173_s4  ;;  %s1313_s15 = smov %s1029_s17 }
 0x108   : > { %s1314_s16 = smov %s1033_s18  ;;  %s1315_s17 = smov %s1318_s10 }
 0x109   : > { %s1316_s18 = smov %s1322_s11  ;;  %19 = sbr.rel (!%p17_p7) target bundleno = 10 (0xa), region = 91 }
 0x10e   :  { %511 = vsyncpa [#allocation3], 1 }
 0x10f   :  { %513 = vsyncpa [#allocation3 + $0x1], 1 }
 0x110   :  { %514 = vsyncpa [#allocation6], 1 }
 0x111   :  { %515 = vsyncpa [#allocation4], 1 }
 0x112   :  { %517 = vsyncpa [#allocation4 + $0x1], 1 }

</bundles_post_ra>
